<compile_context>
chip_gen: v5e
topology: v5e:2x2
jax: 0.10.0
libtpu: 0.0.40
codegen_flags: <defaults>
</compile_context>

<pallas_src>
import math
import functools

import jax
import jax.numpy as jnp
from jax import lax
from jax.experimental import pallas as pl
from jax.experimental.pallas import tpu as pltpu


# ---------------------------------------------------------------------------
# tiling helpers
# ---------------------------------------------------------------------------
def _pick_tile(dim, preferred, align):
    """Largest tile <= preferred that is a multiple of `align` AND divides `dim`;
    falls back to the full dim (a block dim equal to the array dim is always legal)."""
    if dim <= preferred:
        return dim
    t = (preferred // align) * align
    while t >= align:
        if dim % t == 0:
            return t
        t -= align
    return dim


def _choose_tiles(O, K, HW):
    # Lane (HW) tile: prefer 512 (v6e/v7x roofline sweet spot), capped so the f32 input tile
    # (K x t_hw, double-buffered) stays well inside v5e's 16 MiB scoped-VMEM default.
    hw_cap = max(128, (4 * 1024 * 1024) // max(4 * K, 1))
    t_hw = _pick_tile(HW, min(512, hw_cap), 128)
    # Sublane (O) tile (output channels).
    t_o = _pick_tile(O, 256, 8)
    return t_o, t_hw


# ---------------------------------------------------------------------------
# fused Pallas kernel: conv matmul + folded BN affine (or bias) + ReLU
# ---------------------------------------------------------------------------
def conv_affine_act_kernel(w_ref, x_ref, shift_ref, o_ref, *, apply_relu):
    """One fused tile: out = relu( (w @ x) + shift ).

    w_ref:     (t_o, K)    bf16   (BN scale already folded into the weights)
    x_ref:     (K, t_hw)   f32    (batch dim squeezed by the BlockSpec; cast in-kernel)
    shift_ref: (t_o, 1)    f32    (BN  beta - mean*scale,  or conv bias)
    o_ref:     (t_o, t_hw) f32
    """
    y = jnp.dot(w_ref[...], x_ref[...].astype(jnp.bfloat16),
                preferred_element_type=jnp.float32)
    y = y + shift_ref[...]                       # lane-broadcast of the per-channel shift
    if apply_relu:
        y = jnp.maximum(y, 0.0)
    o_ref[...] = y


def conv_affine_act(x3, w_bf16, shift, *, apply_relu):
    """x3: (N, K, HW) f32;  w_bf16: (O, K) bf16;  shift: (O, 1) f32  ->  (N, O, HW) f32."""
    N, K, HW = x3.shape
    O = w_bf16.shape[0]
    t_o, t_hw = _choose_tiles(O, K, HW)
    grid = (N, O // t_o, HW // t_hw)
    return pl.pallas_call(
        functools.partial(conv_affine_act_kernel, apply_relu=apply_relu),
        out_shape=jax.ShapeDtypeStruct((N, O, HW), jnp.float32),
        grid_spec=pltpu.PrefetchScalarGridSpec(
            num_scalar_prefetch=0,
            grid=grid,
            in_specs=[
                # weights and shift use constant index maps along n/j -> stay VMEM-resident
                pl.BlockSpec((t_o, K), lambda n, i, j: (i, 0)),
                pl.BlockSpec((None, K, t_hw), lambda n, i, j: (n, 0, j)),
                pl.BlockSpec((t_o, 1), lambda n, i, j: (i, 0)),
            ],
            out_specs=pl.BlockSpec((None, t_o, t_hw), lambda n, i, j: (n, i, j)),
        ),
        compiler_params=pltpu.CompilerParams(
            dimension_semantics=("parallel", "parallel", "parallel")),
    )(w_bf16, x3, shift)


# ---------------------------------------------------------------------------
# channels-first im2col:  (N, C, H, W) -> (N, C*KH*KW, OH*OW)
# (for 1x1 convs this is a pure strided-slice + reshape; no transposes)
# ---------------------------------------------------------------------------
def im2col_cf(x, kernel_size, stride, padding, dilation):
    N, C, H, W = x.shape
    KH, KW = kernel_size
    SH, SW = stride
    PH, PW = padding
    DH, DW = dilation
    OH = (H + 2 * PH - DH * (KH - 1) - 1) // SH + 1
    OW = (W + 2 * PW - DW * (KW - 1) - 1) // SW + 1
    if KH == 1 and KW == 1 and PH == 0 and PW == 0:
        xs = x[:, :, ::SH, ::SW]
        return xs.reshape(N, C, OH * OW), OH, OW
    # TODO(synk): general KxK path still materializes patches in HBM (no shifted-window DMA).
    xp = jnp.pad(x, ((0, 0), (0, 0), (PH, PH), (PW, PW)))
    cols = []
    for kh in range(KH):
        for kw in range(KW):
            h0 = kh * DH
            w0 = kw * DW
            cols.append(xp[:, :, h0: h0 + (OH - 1) * SH + 1: SH,
                              w0: w0 + (OW - 1) * SW + 1: SW])   # (N, C, OH, OW)
    stk = jnp.stack(cols, axis=2)                                # (N, C, KH*KW, OH, OW)
    return stk.reshape(N, C * KH * KW, OH * OW), OH, OW


# ---------------------------------------------------------------------------
# BasicConv (DOConv2d + BatchNorm2d(train) [+ ReLU]) — single fused Pallas pass
# ---------------------------------------------------------------------------
class BasicConvPallas:
    def __init__(self, key, in_planes, out_planes, kernel_size,
                 stride=1, padding=0, dilation=1, groups=1, relu=True, bn=True):
        assert groups == 1, "MDPM's shortcut uses groups=1 (DO-Conv)"
        self.in_planes = in_planes
        self.out_planes = out_planes
        self.kernel_size = (kernel_size, kernel_size) if isinstance(kernel_size, int) \
            else tuple(kernel_size)
        self.stride = (stride, stride)
        self.padding = (padding, padding)
        self.dilation = (dilation, dilation)
        self.groups = groups
        self.relu = relu
        self.bn = bn
        KH, KW = self.kernel_size
        self.D_mul = KH * KW

        # --- DOConv2d params (PyTorch init) ---
        fan_in = (in_planes // groups) * self.D_mul
        bound = 1.0 / math.sqrt(fan_in)
        kW, kb = jax.random.split(key)
        self.W = jax.random.uniform(
            kW, (out_planes, in_planes // groups, self.D_mul),
            minval=-bound, maxval=bound, dtype=jnp.float32)
        if KH * KW > 1:
            self.D = jnp.zeros((in_planes, KH * KW, self.D_mul), jnp.float32)
            eye = jnp.eye(KH * KW, dtype=jnp.float32)[None, :, :]
            self.d_diag = jnp.tile(eye, (in_planes, 1, self.D_mul // (KH * KW)))
        else:
            self.D = None
            self.d_diag = None

        if bn:
            # BatchNorm2d params (PyTorch defaults); conv has no bias in this branch
            self.gamma = jnp.ones((out_planes,), jnp.float32)
            self.beta = jnp.zeros((out_planes,), jnp.float32)
            self.bias = None
        else:
            self.gamma = None
            self.beta = None
            self.bias = jax.random.uniform(kb, (out_planes,), minval=-bound,
                                           maxval=bound, dtype=jnp.float32)
        self.eps = 1e-5

    def _compose_dow(self):
        KH, KW = self.kernel_size
        if KH * KW > 1:
            D = self.D + self.d_diag                              # (in, KHKW, D_mul)
            Wr = self.W.reshape(self.out_planes // self.groups,
                                self.in_planes, self.D_mul)       # (o, i, s)
            DoW = jnp.einsum('ims,ois->oim', D, Wr)               # (o, i, KHKW)
            return DoW.reshape(self.out_planes, self.in_planes // self.groups, KH, KW)
        return self.W.reshape(self.out_planes, self.in_planes // self.groups, KH, KW)

    def __call__(self, x, fuse_output_relu=False):
        O = self.out_planes
        DoW = self._compose_dow()                                 # (O, C, KH, KW) f32
        X, OH, OW = im2col_cf(x, self.kernel_size, self.stride,
                              self.padding, self.dilation)        # (N, K, HW) f32
        N, K, HW = X.shape
        W2 = DoW.reshape(O, K)                                    # (O, K) f32
        M_total = N * HW
        hi = lax.Precision.HIGHEST

        if self.bn:
            # Training-mode BatchNorm statistics over (N, H, W) from sufficient statistics
            # of the input (Gram trick) — computed in f32 BEFORE the matmul so the BN affine
            # and ReLU fuse directly into the matmul kernel (no second pass over y).
            s = jnp.sum(X, axis=(0, 2))                                   # (K,)
            G = jnp.einsum('nkp,nlp->kl', X, X, precision=hi)             # (K, K)
            col_sum = jnp.einsum('ok,k->o', W2, s, precision=hi)          # (O,)
            col_ssq = jnp.einsum('ok,kl,ol->o', W2, G, W2, precision=hi)  # (O,)
            mean = col_sum / M_total
            var = jnp.maximum(col_ssq / M_total - mean * mean, 0.0)
            inv_std = lax.rsqrt(var + self.eps)
            scale = self.gamma * inv_std
            shift = self.beta - mean * scale
        else:
            scale = jnp.ones((O,), jnp.float32)
            shift = self.bias

        # Fold the per-channel scale into the (tiny) weight matrix; cast weights to bf16 once.
        w_scaled = (W2 * scale[:, None]).astype(jnp.bfloat16)             # (O, K) bf16
        shift2 = shift.reshape(O, 1).astype(jnp.float32)

        apply_relu = bool(self.relu) or bool(fuse_output_relu)
        y = conv_affine_act(X, w_scaled, shift2, apply_relu=apply_relu)   # (N, O, HW) f32
        return y.reshape(N, O, OH, OW)                                    # NCHW, no transpose


# ---------------------------------------------------------------------------
# MDPM
# ---------------------------------------------------------------------------
class MDPMPallas:
    def __init__(self, key, in_planes, out_planes, stride=1, scale=0.1,
                 map_reduce=8, vision=1, groups=1):
        self.scale = scale
        self.out_channels = out_planes
        # TODO(synk): EA module is undefined in the spec; treated as identity passthrough.
        # branch0/1/2 + ConvLinear are unused by MDPM.forward and not materialized.
        k_short, _ = jax.random.split(key)
        self.shortcut = BasicConvPallas(k_short, in_planes, out_planes,
                                        kernel_size=1, stride=stride,
                                        relu=False, bn=True, groups=1)

    def __call__(self, x, edge):
        x_feat, am = x, edge                      # EA passthrough (see TODO)
        # shortcut (DO-conv + BN) with MDPM's trailing ReLU fused into the matmul epilogue
        out = self.shortcut(x_feat, fuse_output_relu=True)
        return out, am


# ---------------------------------------------------------------------------
# pure-JAX reference (for correctness check)
# ---------------------------------------------------------------------------
def basicconv_ref(x, mod, fuse_output_relu=False):
    DoW = mod._compose_dow()
    y = lax.conv_general_dilated(
        x, DoW, window_strides=mod.stride,
        padding=[(p, p) for p in mod.padding],
        rhs_dilation=mod.dilation,
        dimension_numbers=("NCHW", "OIHW", "NCHW"),
        precision=lax.Precision.HIGHEST)
    if mod.bn:
        mean = jnp.mean(y, axis=(0, 2, 3), keepdims=True)
        var = jnp.mean((y - mean) ** 2, axis=(0, 2, 3), keepdims=True)
        y = (y - mean) * lax.rsqrt(var + mod.eps)
        y = y * mod.gamma.reshape(1, -1, 1, 1) + mod.beta.reshape(1, -1, 1, 1)
    else:
        y = y + mod.bias.reshape(1, -1, 1, 1)
    if mod.relu or fuse_output_relu:
        y = jnp.maximum(y, 0.0)
    return y


# ---------------------------------------------------------------------------
if __name__ == "__main__":
    key = jax.random.PRNGKey(0)
    kx, ke, kp, kb = jax.random.split(key, 4)

    x = jax.random.normal(kx, (2, 4, 16, 16), dtype=jnp.float32)      # NCHW
    edge = jax.random.normal(ke, (2, 1, 16, 16), dtype=jnp.float32)

    # --- MDPM forward (shortcut 1x1 conv + BN + fused ReLU; EA passthrough) ---
    mdpm = MDPMPallas(kp, in_planes=4, out_planes=8, stride=1)
    out, am = jax.jit(lambda a, b: mdpm(a, b))(x, edge)
    out = jax.block_until_ready(out)
    assert out.shape == (2, 8, 16, 16), out.shape
    assert am.shape == edge.shape
    assert bool(jnp.all(out >= 0.0))                                  # ReLU applied
    ref = basicconv_ref(x, mdpm.shortcut, fuse_output_relu=True)
    err = float(jnp.max(jnp.abs(out - ref)))
    assert err < 1e-1, f"MDPM shortcut mismatch: max abs err {err}"

    # --- also exercise the general KxK BasicConv path (3x3, BN + ReLU) ---
    bc = BasicConvPallas(kb, in_planes=4, out_planes=8, kernel_size=3,
                         stride=1, padding=1, relu=True, bn=True)
    y3 = jax.jit(lambda t: bc(t))(x)
    y3 = jax.block_until_ready(y3)
    assert y3.shape == (2, 8, 16, 16), y3.shape
    ref3 = basicconv_ref(x, bc)
    err3 = float(jnp.max(jnp.abs(y3 - ref3)))
    assert err3 < 1e-1, f"BasicConv 3x3 mismatch: max abs err {err3}"

    print("KERNEL_OK")
</pallas_src>

<mosaic_0001>
module attributes {stable_mosaic.version = 11 : i64} {
  func.func @conv_affine_act_kernel(%arg0: i32, %arg1: i32, %arg2: i32, %arg3: memref<8x4xbf16, #tpu.memory_space<vmem>>, %arg4: memref<1x4x256xf32, #tpu.memory_space<vmem>>, %arg5: memref<8x1xf32, #tpu.memory_space<vmem>>, %arg6: memref<1x8x256xf32, #tpu.memory_space<vmem>>) attributes {dimension_semantics = [#tpu.dimension_semantics<parallel>, #tpu.dimension_semantics<parallel>, #tpu.dimension_semantics<parallel>], iteration_bounds = array<i64: 2, 1, 1>, scalar_prefetch = 0 : i64, scratch_operands = 0 : i64, tpu.core_type = #tpu.core_type<tc>, window_params = [{transform_indices = @transform_0, window_bounds = array<i64: 8, 4>}, {transform_indices = @transform_1, window_bounds = array<i64: 1, 4, 256>}, {transform_indices = @transform_2, window_bounds = array<i64: 8, 1>}, {transform_indices = @transform_3, window_bounds = array<i64: 1, 8, 256>}]} {
    %c0 = arith.constant 0 : index
    %c0_0 = arith.constant 0 : index
    %0 = vector.load %arg3[%c0, %c0_0] : memref<8x4xbf16, #tpu.memory_space<vmem>>, vector<8x4xbf16>
    %c0_1 = arith.constant 0 : index
    %c0_2 = arith.constant 0 : index
    %c0_3 = arith.constant 0 : index
    %1 = vector.load %arg4[%c0_1, %c0_2, %c0_3] : memref<1x4x256xf32, #tpu.memory_space<vmem>>, vector<1x4x256xf32>
    %2 = vector.shape_cast %1 : vector<1x4x256xf32> to vector<4x256xf32>
    %3 = arith.truncf %2 : vector<4x256xf32> to vector<4x256xbf16>
    %cst = arith.constant dense<0.000000e+00> : vector<8x256xf32>
    %4 = tpu.matmul %0, %3, %cst {dimension_numbers = #tpu.dot_dimension_numbers<[1], [0], [0], [1], [0, 0, 1, 1], [], []>} : vector<8x4xbf16>, vector<4x256xbf16>, vector<8x256xf32> -> vector<8x256xf32>
    %c0_4 = arith.constant 0 : index
    %c0_5 = arith.constant 0 : index
    %5 = vector.load %arg5[%c0_4, %c0_5] : memref<8x1xf32, #tpu.memory_space<vmem>>, vector<8x1xf32>
    %6 = vector.broadcast %5 : vector<8x1xf32> to vector<8x256xf32>
    %7 = arith.addf %4, %6 : vector<8x256xf32>
    %cst_6 = arith.constant 0.000000e+00 : f32
    %8 = vector.broadcast %cst_6 : f32 to vector<8x256xf32>
    %9 = arith.maximumf %7, %8 : vector<8x256xf32>
    %c0_7 = arith.constant 0 : index
    %c0_8 = arith.constant 0 : index
    %c0_9 = arith.constant 0 : index
    %10 = vector.load %arg6[%c0_7, %c0_8, %c0_9] : memref<1x8x256xf32, #tpu.memory_space<vmem>>, vector<1x8x256xf32>
    %11 = vector.shape_cast %10 : vector<1x8x256xf32> to vector<8x256xf32>
    %12 = vector.shape_cast %9 : vector<8x256xf32> to vector<1x8x256xf32>
    tpu.vector_store %arg6[%c0_7, %c0_8, %c0_9], %12 {strides = array<i32>} : memref<1x8x256xf32, #tpu.memory_space<vmem>>, vector<1x8x256xf32>,
    return
  }
  func.func @transform_0(%arg0: i32, %arg1: i32, %arg2: i32) -> (i32, i32) {
    %c0_i32 = arith.constant 0 : i32
    %c0_i32_0 = arith.constant 0 : i32
    return %arg1, %c0_i32 : i32, i32
  }
  func.func @transform_1(%arg0: i32, %arg1: i32, %arg2: i32) -> (i32, i32, i32) {
    %c0_i32 = arith.constant 0 : i32
    %c0_i32_0 = arith.constant 0 : i32
    return %arg0, %c0_i32, %arg2 : i32, i32, i32
  }
  func.func @transform_2(%arg0: i32, %arg1: i32, %arg2: i32) -> (i32, i32) {
    %c0_i32 = arith.constant 0 : i32
    %c0_i32_0 = arith.constant 0 : i32
    return %arg1, %c0_i32 : i32, i32
  }
  func.func @transform_3(%arg0: i32, %arg1: i32, %arg2: i32) -> (i32, i32, i32) {
    %c0_i32 = arith.constant 0 : i32
    return %arg0, %arg1, %arg2 : i32, i32, i32
  }
}

</mosaic_0001>

<bundles_post_ra>
// kernel: _lambda_.1
= control target key start
LH: loop header
LB: loop body
LE: loop exit
PB: predicated region body
PF: predicated region fallthrough
CT: control target
= control target key end

     0   :  { %s543_s12 = smov 0   ;;  %s545_s13 = smov 0   ;;  %s582_s0 = inlined_call_operand.vmem [shape: bf16[8,4], index: 0, kind: input, shape index: {}]   ;;  %s583_s1 = inlined_call_operand.vmem [shape: f32[2,4,256], index: 1, kind: input, shape index: {}]   ;;  %s584_s2 = inlined_call_operand.vmem [shape: f32[8,1], index: 2, kind: input, shape index: {}]   ;;  %s585_s3 = inlined_call_operand.vmem [shape: f32[2,8,256], index: 3, kind: output, shape index: {}]  }
   0x1   :  { %s547_s14 = smov 0  }
   0x2 LB: > { %s32_s15 = sadd.s32 1, %s516_s13  ;;  %p461_p0 = scmp.ge.s32.totalorder %s520_s14, 1  ;;  %s520_s14 = sphi %s547_s14, %s13_s14   ;;  %s516_s13 = sphi %s545_s13, %s587_s13   ;;  %s512_s12 = sphi %s543_s12, %s586_s12  }
   0x3   : > { %p34_p1 = scmp.ge.s32.totalorder %s32_s15, 2  ;;  %p185_p2 = scmp.lt.s32.totalorder %s520_s14, 3 }
   0x5   : > { %s589_s15 = smov (%p34_p1, %s32_s15), 0  ;;  %p186_p3 = pnand %p461_p0, %p185_p2 }
   0x6   : > { %p234_p4 = scmp.lt.s32.totalorder (!%p186_p3), %s512_s12, 1 }
   0x7   : > { %189 = sbr.rel (%p186_p3) target bundleno = 164 (0xa4), region = 32 }
   0xc   : > { %v522_v0 = vmov 0   ;;  %v272_v1 = vld [vmem:[%s584_s2] sm:$0xff]  ;;  %s591_s12 = smov (!%p234_p4, %s512_s12), 1  ;;  %vm282_vm0 = vcmask 1041408   ;;  %vm278_vm1 = vcmask 31744  }
   0xd   : > { %497 = vset.pattern.permute.xlu0 %v522_v0  ;;  %s470_s18 = sshll.u32 %s591_s12, 3  ;;  %v262_v9 = vld [vmem:[%s582_s0] sm:$0xf]  ;;  %s471_s24 = sshll.u32 %s591_s12, 4 }
   0xe   : > { %275 = vperm.xlu0 %497, %v272_v1   ;;  %s241_s21 = scalar_lea.vmem %s583_s1, %s470_s18  ;;  %s259_s27 = scalar_lea.vmem %s585_s3, %s471_s24 }
   0xf   : > { %v263_v2 = vld [vmem:[%s241_s21] sm:$0xff] }
  0x10   : > { %265 = vst [vmem:[#allocation1] ss:$2 sm:$0xff] %v263_v2 }
  0x17   : > { %v266_v3 = vld.sshfl [vmem:[#allocation1] sm:$0xff pattern:$0x75316420]  ;;  %v267_v4 = vld.sshfl [vmem:[#allocation1 + $0x8] sm:$0xff pattern:$0x75316420] }
  0x18   : > { %v270_v5 = vpack.c.bf16 %v266_v3, %v266_v3  ;;  %v271_v6 = vpack.c.bf16 %v267_v4, %v267_v4 }
  0x1a   : > { %v284_v7 = vsel %vm282_vm0, %v270_v5, 0  ;;  %v287_v8 = vsel %vm282_vm0, %v271_v6, 0 }
  0x1b   : > { %296 = vmatpush.bf16.msra.mxu0 %v284_v7  ;;  %309 = vmatpush.bf16.msra.mxu1 %v287_v8 }
  0x1e   : > { %466 = vmatmul.msk.bf16.vlgmr.msra.gmra.mxu0 %vm278_vm1, %v262_v9  ;;  %467 = vmatmul.msk.bf16.vlgmr.msra.gmra.mxu1 %vm278_vm1, %v262_v9 }
  0x80   : > { %v276_v10 = vpop.permute.xlu0 %275 }
  0x9b   : > { %v298_v11 = vpop.f32.mrf.mxu0  ;;  %v311_v12 = vpop.f32.mrf.mxu1 }
  0x9c   : > { %v299_v13 = vadd.f32 %v298_v11, %v276_v10  ;;  %v312_v14 = vadd.f32 %v311_v12, %v276_v10 }
  0x9e   : > { %v315_v15 = vmax.f32 %v299_v13, 0.0  ;;  %v316_v16 = vmax.f32 %v312_v14, 0.0 }
  0xa0   : > { %317 = vst [vmem:[%s259_s27] sm:$0xff] %v315_v15 }
  0xa1   : > { %318 = vst [vmem:[%s259_s27 + $0x8] sm:$0xff] %v316_v16 }
  0xa3   : > { %v300_v17 = vpop.f32.mrf.mxu0  ;;  %v313_v18 = vpop.f32.mrf.mxu1 }
  0xa4 PF: > { %s13_s14 = sadd.s32 1, %s520_s14   ;;  %s586_s12 = smov %s516_s13 }
  0xa5   : > { %p10_p5 = scmp.ge.s32.totalorder %s13_s14, 4   ;;  %s587_s13 = smov %s589_s15 }
  0xa7   :  { %12 = sbr.rel (!%p10_p5) target bundleno = 2 (0x2), region = 68 }

</bundles_post_ra>
